<compile_context>
chip_gen: v6e
topology: v6e:2x2x1
jax: 0.10.0
libtpu: 0.0.40
codegen_flags: <defaults>
</compile_context>

<pallas_src>
import jax
import jax.numpy as jnp
from jax.experimental import pallas as pl
from jax.experimental.pallas import tpu as pltpu

_LANE = 128
_MAX_TILE_BYTES = 2 * 1024 * 1024  # per-buffer block-size target (~2 MiB)


def _prelu_kernel(x_ref, alpha_ref, o_ref):
    x = x_ref[...]
    a = alpha_ref[0]  # scalar from SMEM; broadcasts on the VPU
    o_ref[...] = jnp.where(x >= 0, x, x * a)


def _row_tile(rows, itemsize):
    """Row tile: dtype-aware sublane granule, ~2 MiB cap, >=2 tiles when possible."""
    granule = max(8, 32 // itemsize)  # f32 -> 8, bf16 -> 16, int8/fp8 -> 32
    max_rows = max(granule, (_MAX_TILE_BYTES // (_LANE * itemsize)) // granule * granule)
    # Prefer at least 2 grid steps so v7x's two TensorCores both get work.
    half = pl.cdiv(pl.cdiv(rows, 2), granule) * granule
    return min(max_rows, max(granule, half))


def prelu(x, alpha):
    """PReLU with a single scalar weight: where(x >= 0, x, alpha * x)."""
    orig_shape = x.shape
    dtype = x.dtype
    n = x.size
    if n == 0:
        return x

    itemsize = jnp.dtype(dtype).itemsize
    # TODO(synk): alpha is cast to the input dtype; PyTorch keeps the PReLU
    # weight in its own (fp32) dtype, so last-ulp differences are possible for
    # low-precision inputs.
    alpha_arr = jnp.asarray(alpha, dtype=dtype).reshape(1)

    padded = (n % _LANE) != 0
    if not padded:
        rows = n // _LANE
        x2 = x.reshape(rows, _LANE)  # free reshape (contiguous)
    else:
        rows = pl.cdiv(n, _LANE)
        flat = jnp.ravel(x)
        flat = jnp.pad(flat, (0, rows * _LANE - n))  # only the ragged tail row
        x2 = flat.reshape(rows, _LANE)

    tm = _row_tile(rows, itemsize)
    grid = (pl.cdiv(rows, tm),)  # ragged last block is masked by Pallas

    cost = pl.CostEstimate(
        flops=2 * n,
        transcendentals=0,
        bytes_accessed=2 * n * itemsize + itemsize,
    )

    out = pl.pallas_call(
        _prelu_kernel,
        out_shape=jax.ShapeDtypeStruct((rows, _LANE), dtype),
        grid_spec=pltpu.PrefetchScalarGridSpec(
            num_scalar_prefetch=0,
            grid=grid,
            in_specs=[
                pl.BlockSpec((tm, _LANE), lambda i: (i, 0)),            # x tiles
                pl.BlockSpec(memory_space=pltpu.MemorySpace.SMEM),      # alpha scalar
            ],
            out_specs=pl.BlockSpec((tm, _LANE), lambda i: (i, 0)),
        ),
        compiler_params=pltpu.CompilerParams(
            dimension_semantics=("parallel",),  # lets v7x shard tiles across TCs
        ),
        cost_estimate=cost,
    )(x2, alpha_arr)

    if not padded:
        return out.reshape(orig_shape)  # free reshape, no extra HBM pass
    return out.reshape(-1)[:n].reshape(orig_shape)


class PReLU:
    """JAX mirror of torch.nn.PReLU() — one learnable scalar weight, init 0.25."""

    # TODO(synk): the spec's forward calls F.prelu(x) with no weight (which errors
    # in PyTorch); we follow nn.PReLU defaults (num_parameters=1, init=0.25).

    def __init__(self):
        self.weight = jnp.float32(0.25)

    def __call__(self, x):
        return prelu(x, self.weight)


if __name__ == "__main__":
    key = jax.random.PRNGKey(0)
    x = jax.random.normal(key, (2, 4, 16, 16), dtype=jnp.float32)

    module = PReLU()
    out = jax.block_until_ready(module(x))

    # Pure-JAX reference check.
    ref = jnp.where(x >= 0, x, module.weight * x)
    assert out.shape == x.shape
    assert jnp.allclose(out, ref, atol=1e-6, rtol=1e-6)

    print("KERNEL_OK")
</pallas_src>

<mosaic_0001>
module attributes {stable_mosaic.version = 11 : i64} {
  func.func @_prelu_kernel(%arg0: i32, %arg1: memref<8x128xf32, #tpu.memory_space<vmem>>, %arg2: memref<1xf32, #tpu.memory_space<smem>>, %arg3: memref<8x128xf32, #tpu.memory_space<vmem>>) attributes {dimension_semantics = [#tpu.dimension_semantics<parallel>], iteration_bounds = array<i64: 2>, scalar_prefetch = 0 : i64, scratch_operands = 0 : i64, tpu.core_type = #tpu.core_type<tc>, window_params = [{transform_indices = @transform_0, window_bounds = array<i64: 8, 128>}, {transform_indices = @transform_1, window_bounds = array<i64: 1>}, {transform_indices = @transform_2, window_bounds = array<i64: 8, 128>}]} {
    %c0 = arith.constant 0 : index
    %c0_0 = arith.constant 0 : index
    %0 = vector.load %arg1[%c0, %c0_0] : memref<8x128xf32, #tpu.memory_space<vmem>>, vector<8x128xf32>
    %c0_1 = arith.constant 0 : index
    %1 = memref.load %arg2[%c0_1] : memref<1xf32, #tpu.memory_space<smem>>
    %cst = arith.constant 0.000000e+00 : f32
    %2 = vector.broadcast %cst : f32 to vector<8x128xf32>
    %3 = arith.cmpf oge, %0, %2 : vector<8x128xf32>
    %4 = vector.broadcast %1 : f32 to vector<8x128xf32>
    %5 = arith.mulf %0, %4 : vector<8x128xf32>
    %6 = arith.select %3, %0, %5 : vector<8x128xi1>, vector<8x128xf32>
    %c0_2 = arith.constant 0 : index
    %c0_3 = arith.constant 0 : index
    %7 = vector.load %arg3[%c0_2, %c0_3] : memref<8x128xf32, #tpu.memory_space<vmem>>, vector<8x128xf32>
    tpu.vector_store %arg3[%c0_2, %c0_3], %6 {strides = array<i32>} : memref<8x128xf32, #tpu.memory_space<vmem>>, vector<8x128xf32>,
    return
  }
  func.func @transform_0(%arg0: i32) -> (i32, i32) {
    %c0_i32 = arith.constant 0 : i32
    %c0_i32_0 = arith.constant 0 : i32
    return %arg0, %c0_i32 : i32, i32
  }
  func.func @transform_1(%arg0: i32) -> i32 {
    %c0_i32 = arith.constant 0 : i32
    %c0_i32_0 = arith.constant 0 : i32
    return %c0_i32 : i32
  }
  func.func @transform_2(%arg0: i32) -> (i32, i32) {
    %c0_i32 = arith.constant 0 : i32
    %c0_i32_0 = arith.constant 0 : i32
    return %arg0, %c0_i32 : i32, i32
  }
}

</mosaic_0001>

<bundles_post_ra>
// kernel: tpu_custom_call.1
= control target key start
LH: loop header
LB: loop body
LE: loop exit
PB: predicated region body
PF: predicated region fallthrough
CT: control target
= control target key end

     0   :  { %s570_s0 = inlined_call_operand.hbm [shape: f32[16,128], index: 0, kind: input, shape index: {}]   ;;  %s571_s1 = inlined_call_operand.<no memory space> [shape: f32[1], index: 1, kind: input, shape index: {}]   ;;  %s572_s2 = inlined_call_operand.hbm [shape: f32[16,128], index: 2, kind: output, shape index: {}]  }
   0x1   :  { %7 = sst [smem:[#allocation2]] %s571_s1 }
   0x2   :  { %8 = vsyncpa [#allocation4], 0 }
   0x3   :  { %10 = vsyncpa [#allocation4 + $0x1], 0 }
   0x4   :  { %11 = vsyncpa [#allocation5], 0 }
   0x5   :  { %13 = vsyncpa [#allocation5 + $0x1], 0  ;;  %s423_s11 = smov 0   ;;  %s425_s12 = smov 0  }
   0x6   :  { %s427_s13 = smov 0   ;;  %s429_s14 = smov 0  }
   0x7 LB: > { %s444_s1 = sadd.s32 4294967295, %s401_s14   ;;  %s251_s15 = sadd.s32 4294967294, %s401_s14   ;;  %s401_s14 = sphi %s429_s14, %s589_s14   ;;  %s397_s13 = sphi %s427_s13, %s588_s13   ;;  %s393_s12 = sphi %s425_s12, %s587_s12   ;;  %s389_s11 = sphi %s423_s11, %s586_s11  }
   0x8   : > { %s448_s16 = sadd.s32 1, %s401_s14   ;;  %s26_s17 = sadd.s32 1, %s397_s13 }
   0x9   : > { %s23_s18 = ssub.s32 %s401_s14, %s448_s16  ;;  %p33_p0 = scmp.ne.s32.totalorder %s397_s13, %s393_s12 }
   0xa   : > { %p24_p1 = scmp.eq.s32.totalorder %s23_s18, 0  ;;  %p34_p2 = scmp.eq.s32.totalorder %s401_s14, 0 }
   0xb   : > { %p39_p3 = scmp.ne.s32.totalorder %s393_s12, %s389_s11  ;;  %p40_p4 = scmp.eq.s32.totalorder %s444_s1, 0 }
   0xc   : > { %s460_s19 = scalar_select %p24_p1, %s397_s13, %s26_s17  }
   0xd   : > { %p462_p5 = por %p34_p2, %p33_p0  ;;  %p466_p6 = por %p40_p4, %p39_p3 }
   0xe   : > { %p84_p7 = scmp.eq.s32.totalorder %s444_s1, 1  ;;  %p90_p8 = scmp.eq.s32.totalorder %s251_s15, 1 }
   0xf   : > { %s576_s21 = scalar_select %p466_p6, 1, 0 }
  0x10   : > { %p275_p10 = scmp.lt.s32.totalorder %s401_s14, 2  ;;  %p473_p11 = por %p84_p7, %p33_p0 }
  0x11   : > { %p477_p12 = por %p90_p8, %p39_p3  ;;  %s113_s24 = sand.u32 1, %s397_s13  }
  0x12   : > { %s577_s22 = scalar_select %p473_p11, 1, 0 }
  0x13   : > { %s578_s23 = scalar_select %p477_p12, 1, 0 }
  0x14   : > { %s255_s25 = sshll.u32 %s401_s14, 7  ;;  %s254_s26 = sshll.u32 %s113_s24, 3 }
  0x15   : > { %s486_s29 = scalar_lea.hbm %s570_s0, %s255_s25  ;;  %s117_s30 = scalar_lea.vmem [#allocation3], %s254_s26 }
  0x16   : > { %s124_s3 = sshll.u32 %s117_s30, 4  ;;  %p490_p13 = pnand %p275_p10, %p462_p5  ;;  %s494_s3 = int_to_ptr.vmem [resolvable:$true] %s124_s3 }
  0x17   : > { %s114_s5 = scalar_lea.sflag [#allocation4], %s113_s24  ;;  %s309_s6 = scalar_lea.hbm %s486_s29, 128 }
  0x18   : > { %p310_p2 = scmp.ne.s32.totalorder %s486_s29, %s309_s6  ;;  %p311_p3 = pneg %p490_p13 }
  0x19   : > { %s314_s9 = scalar_lea.hbm %s570_s0, 256  ;;  %p315_p5 = scmp.lt.s32.totalorder %s486_s29, %s570_s0 }
  0x1a   : > { %p312_p4 = pnand %p311_p3, %p310_p2  ;;  %p316_p8 = scmp.lt.s32.totalorder %s314_s9, %s309_s6 }
  0x1c   : > { %p313_p7 = pneg %p312_p4  ;;  %p317_p10 = por %p316_p8, %p315_p5 }
  0x1e   : > { %p318_p9 = pnand %p317_p10, %p313_p7 }
  0x20   : > { %321 = shalt.err (!%p318_p9)
}
  0x21   : > { %s322_s17 = scalar_lea.vmem %s494_s3, 128  ;;  %s403_s18 = smov [#allocation3]  }
  0x22   : > { %p323_p0 = scmp.ne.s32.totalorder %s494_s3, %s322_s17  ;;  %s327_s20 = sshll.u32 %s403_s18, 4  ;;  %s328_s20 = int_to_ptr.vmem [resolvable:$false] %s327_s20 }
  0x23   : > { %s329_s24 = scalar_lea.vmem %s328_s20, 256  ;;  %p330_p4 = scmp.lt.s32.totalorder %s494_s3, %s328_s20 }
  0x24   : > { %p325_p1 = pnand %p323_p0, %p311_p3  ;;  %p331_p12 = scmp.lt.s32.totalorder %s329_s24, %s322_s17 }
  0x26   : > { %p326_p2 = pneg %p325_p1  ;;  %p332_p11 = por %p331_p12, %p330_p4 }
  0x28   : > { %p333_p6 = pnand %p332_p11, %p326_p2 }
  0x2a   : > { %336 = shalt.err (!%p333_p6)
}
  0x2b   : > { %270 = dma.hbm_to_vmem [thread:$0]  (!%p490_p13), %s486_s29, 128, %s494_s3, %s114_s5  }
  0x2c   : > { %p580_p9 = scmp.lt.s32.totalorder %s401_s14, 3  ;;  %p581_p7 = scmp.ge.s32.totalorder %s401_s14, 1 }
  0x2e   : > { %p130_p0 = pnand %p581_p7, %p580_p9 }
  0x2f   : > { %s521_s25 = sand.u32 (!%p130_p0), 1, %s393_s12   ;;  %p582_p6 = scmp.ne.s32.totalorder (!%p130_p0), %s576_s21, 0 }
  0x30   : > { %133 = sbr.rel (%p130_p0) target bundleno = 79 (0x4f), region = 28  ;;  %s257_s26 = sshll.u32 (!%p130_p0), %s521_s25, 3 }
  0x31   : > { %s136_s27 = scalar_lea.sflag (!%p130_p0), [#allocation4], %s521_s25  ;;  %s139_s28 = scalar_lea.vmem (!%p130_p0), [#allocation3], %s257_s26 }
  0x35   : > { %380 = dma.done.wait (%p582_p6), %s136_s27, 128  }
  0x36   : > { %382 = vsyncadd (%p582_p6), %s136_s27, 4294967168  ;;  %s161_s29 = sld [smem:[#allocation2]]  ;;  %s159_s30 = scalar_lea.vmem [#allocation6], %s257_s26  ;;  %v160_v1 = vld [vmem:[%s139_s28] sm:$0xff] }
  0x37   : > { %s181_s3 = sshll.u32 %s159_s30, 4  ;;  %s260_s4 = sshll.u32 %s444_s1, 7  ;;  %vm162_vm0 = vcmp.ge.f32.partialorder %v160_v1, 0.0  ;;  %s530_s3 = int_to_ptr.vmem [resolvable:$true] %s181_s3 }
  0x38   : > { %s179_s21 = scalar_lea.hbm %s572_s2, %s260_s4  ;;  %s168_s7 = scalar_lea.sflag [#allocation5], %s521_s25 }
  0x39   : > { %s337_s8 = scalar_lea.vmem %s530_s3, 128  ;;  %p583_p12 = scmp.ne.s32.totalorder %s577_s22, 0 }
  0x3a   : > { %p338_p11 = scmp.ne.s32.totalorder %s530_s3, %s337_s8  ;;  %s404_s1 = smov [#allocation6]  }
  0x3b   : > { %s341_s9 = sshll.u32 %s404_s1, 4  ;;  %s342_s9 = int_to_ptr.vmem [resolvable:$false] %s341_s9 }
  0x3c   : > { %v163_v0 = vstv %s161_s29  ;;  %p339_p13 = pnand %p338_p11, %p583_p12  ;;  %s343_s10 = scalar_lea.vmem %s342_s9, 256 }
  0x3d   : > { %v164_v2 = vmul.f32 %v163_v0, %v160_v1  ;;  %p344_p3 = scmp.lt.s32.totalorder %s530_s3, %s342_s9  ;;  %p345_p5 = scmp.lt.s32.totalorder %s343_s10, %s337_s8 }
  0x3e   : > { %p340_p1 = pneg %p339_p13 }
  0x3f   : > { %v165_v3 = vsel %vm162_vm0, %v160_v1, %v164_v2  ;;  %p346_p8 = por %p345_p5, %p344_p3 }
  0x40   : > { %166 = vst [vmem:[%s159_s30] sm:$0xff] %v165_v3 }
  0x41   : > { %p347_p10 = pnand %p346_p8, %p340_p1 }
  0x43   : > { %350 = shalt.err (!%p347_p10)
}
  0x44   : > { %s351_s15 = scalar_lea.hbm %s179_s21, 128  ;;  %s355_s20 = scalar_lea.hbm %s572_s2, 256 }
  0x45   : > { %p352_p2 = scmp.ne.s32.totalorder %s179_s21, %s351_s15  ;;  %p356_p7 = scmp.lt.s32.totalorder %s179_s21, %s572_s2 }
  0x46   : > { %p357_p0 = scmp.lt.s32.totalorder %s355_s20, %s351_s15 }
  0x47   : > { %p353_p4 = pnand %p352_p2, %p583_p12 }
  0x48   : > { %p358_p6 = por %p357_p0, %p356_p7 }
  0x49   : > { %p354_p9 = pneg %p353_p4 }
  0x4b   : > { %p359_p11 = pnand %p358_p6, %p354_p9 }
  0x4d   : > { %362 = shalt.err (!%p359_p11)
}
  0x4e   : > { %265 = dma.vmem_to_hbm [thread:$0]  (%p583_p12), %s530_s3, 128, %s179_s21, %s168_s7  }
  0x4f PF: > { %s193_s26 = sand.u32 1, %s389_s11   ;;  %p584_p13 = scmp.ne.s32.totalorder %s578_s23, 0 }
  0x50   : > { %p585_p1 = scmp.ge.s32.totalorder %s401_s14, 2  ;;  %s194_s27 = scalar_lea.sflag [#allocation5], %s193_s26 }
  0x52   : > { %p272_p3 = pnand %p585_p1, %p584_p13 }
  0x54   : > { %p273_p5 = pneg %p272_p3 }
  0x56   : > { %384 = dma.done.wait (%p273_p5), %s194_s27, 128  }
  0x57   : > { %386 = vsyncadd (%p273_p5), %s194_s27, 4294967168  ;;  %p16_p8 = scmp.ge.s32.totalorder %s448_s16, 4   ;;  %s586_s11 = smov %s393_s12 }
  0x58   : > { %s587_s12 = smov %s397_s13  ;;  %s588_s13 = smov %s460_s19 }
  0x59   : > { %s589_s14 = smov %s448_s16  ;;  %18 = sbr.rel (!%p16_p8) target bundleno = 7 (0x7), region = 73 }
  0x5e   :  { %199 = vsyncpa [#allocation4], 1 }
  0x5f   :  { %201 = vsyncpa [#allocation4 + $0x1], 1 }
  0x60   :  { %202 = vsyncpa [#allocation5], 1 }
  0x61   :  { %204 = vsyncpa [#allocation5 + $0x1], 1 }

</bundles_post_ra>
